<compile_context>
chip_gen: v7x
topology: tpu7x:2x2x1
jax: 0.10.0
libtpu: 0.0.40
codegen_flags: <defaults>
</compile_context>

<pallas_src>
import jax
import jax.numpy as jnp
from jax import lax
from jax.experimental import pallas as pl
from jax.experimental.pallas import tpu as pltpu

_LANE = 128
_SUBLANE = 8
_EPS = 1e-16
_TILE_BYTE_BUDGET = 2 * 1024 * 1024   # per score block (double-buffered) — safe on v5e/v6e/v7x


def _ce_kernel(x_ref, tgt_ref, msk_ref, out_ref):
    n_classes = x_ref.shape[1]
    x = x_ref[...].astype(jnp.float32)                                   # (B, C, T)
    tgt = tgt_ref[...]                                                   # (B, 1, T) int32
    m01 = (msk_ref[...].astype(jnp.float32) == 1.0).astype(jnp.float32)  # (B, 1, T)

    # fused, numerically-stable log-softmax over the class axis
    xmax = jnp.max(x, axis=1, keepdims=True)
    shifted = x - xmax
    lse = jnp.log(jnp.sum(jnp.exp(shifted), axis=1, keepdims=True))
    logp = shifted - lse                                                 # (B, C, T)

    pad = out_ref.shape[-1]
    lane = lax.broadcasted_iota(jnp.int32, (1, _SUBLANE, pad), 2)

    # lane n_classes carries the masked-pixel count for this tile
    acc = jnp.where(lane == n_classes, jnp.sum(m01), 0.0)
    for c in range(n_classes):
        sel = (tgt == c).astype(jnp.float32)            # one-hot channel c, (B,1,T)
        # _one_hot_mask_encoder: class-0 mask channel is all-ones, others are (mask==1)
        w = sel if c == 0 else sel * m01
        num_c = jnp.sum(-logp[:, c:c + 1, :] * w)       # scalar partial numerator
        acc = acc + jnp.where(lane == c, num_c, 0.0)
    out_ref[...] = acc


def cross_entropy_loss(inputs, target, mask, n_classes):
    """Pallas equivalent of CrossEntropyLoss(n_classes)(inputs, target, mask)."""
    B, C, H, W = inputs.shape
    assert C == n_classes and n_classes >= 1
    hw = H * W

    # native layout: (B, C, H*W) reshape is free (no transpose, no extra HBM pass)
    x = inputs.reshape(B, C, hw)
    tgt = target.reshape(B, 1, hw).astype(jnp.int32)     # integer labels in-kernel
    msk = mask.reshape(B, 1, hw)

    # spatial tile: biggest multiple of 128 whose (B, C, T) score block fits the budget
    itemsize = jnp.dtype(x.dtype).itemsize
    t = max(_LANE, (_TILE_BYTE_BUDGET // (B * C * itemsize)) // _LANE * _LANE)
    hw128 = ((hw + _LANE - 1) // _LANE) * _LANE
    t = min(t, hw128)
    n_tiles = -(-hw // t)
    hw_pad = n_tiles * t
    if hw_pad != hw:
        p = hw_pad - hw
        x = jnp.pad(x, ((0, 0), (0, 0), (0, p)))
        tgt = jnp.pad(tgt, ((0, 0), (0, 0), (0, p)), constant_values=-1)  # matches no class
        msk = jnp.pad(msk, ((0, 0), (0, 0), (0, p)), constant_values=0)   # never counted

    pad = ((n_classes + 1 + _LANE - 1) // _LANE) * _LANE

    out = pl.pallas_call(
        _ce_kernel,
        out_shape=jax.ShapeDtypeStruct((n_tiles, _SUBLANE, pad), jnp.float32),
        grid=(n_tiles,),
        in_specs=[
            pl.BlockSpec((B, C, t), lambda j: (0, 0, j)),
            pl.BlockSpec((B, 1, t), lambda j: (0, 0, j)),
            pl.BlockSpec((B, 1, t), lambda j: (0, 0, j)),
        ],
        out_specs=pl.BlockSpec((1, _SUBLANE, pad), lambda j: (j, 0, 0)),
        compiler_params=pltpu.CompilerParams(dimension_semantics=("parallel",)),
    )(x, tgt, msk)

    # finalize on (C,) scalars in the wrapper (keeps the grid axis accumulator-free)
    totals = jnp.sum(out[:, 0, :], axis=0)               # (pad,)
    num = totals[:n_classes]                             # per-class numerators
    mask_cnt = totals[n_classes]                         # count of (mask == 1) pixels
    n_pix = float(B * H * W)                             # class-0 mask channel is all ones
    denom = jnp.where(jnp.arange(n_classes) == 0, n_pix, mask_cnt) + _EPS
    return jnp.sum(num / denom) / n_classes


def cross_entropy_loss_ref(inputs, target, mask, n_classes):
    # pure-JAX reference mirroring the PyTorch module line by line
    p = jax.nn.softmax(inputs, axis=1)
    t_oh = jnp.concatenate(
        [(target == i).astype(jnp.float32) for i in range(n_classes)], axis=1)
    m_oh = jnp.concatenate(
        [(mask * i == i * jnp.ones_like(mask)).astype(jnp.float32)
         for i in range(n_classes)], axis=1)
    loss = 0.0
    for i in range(n_classes):
        loss = loss + jnp.sum(-t_oh[:, i] * jnp.log(p[:, i]) * m_oh[:, i]) / (
            jnp.sum(m_oh[:, i]) + _EPS)
    return loss / n_classes


if __name__ == "__main__":
    key = jax.random.PRNGKey(0)
    k1, k2, k3 = jax.random.split(key, 3)
    B, C, H, W = 2, 4, 16, 16

    logits = jax.random.normal(k1, (B, C, H, W), jnp.float32)
    target = jax.random.randint(k2, (B, 1, H, W), 0, C).astype(jnp.float32)
    mask = (jax.random.uniform(k3, (B, 1, H, W)) > 0.5).astype(jnp.float32)

    out = cross_entropy_loss(logits, target, mask, C)
    jax.block_until_ready(out)
    ref = cross_entropy_loss_ref(logits, target, mask, C)
    assert jnp.allclose(out, ref, atol=1e-5, rtol=1e-5), (out, ref)

    print("KERNEL_OK")
</pallas_src>

<mosaic_0001>
module attributes {stable_mosaic.version = 11 : i64} {
  func.func @_ce_kernel(%arg0: i32, %arg1: memref<2x4x256xf32, #tpu.memory_space<vmem>>, %arg2: memref<2x1x256xi32, #tpu.memory_space<vmem>>, %arg3: memref<2x1x256xf32, #tpu.memory_space<vmem>>, %arg4: memref<1x8x128xf32, #tpu.memory_space<vmem>>) attributes {dimension_semantics = [#tpu.dimension_semantics<parallel>], iteration_bounds = array<i64: 1>, scalar_prefetch = 0 : i64, scratch_operands = 0 : i64, tpu.core_type = #tpu.core_type<tc>, window_params = [{transform_indices = @transform_0, window_bounds = array<i64: 2, 4, 256>}, {transform_indices = @transform_1, window_bounds = array<i64: 2, 1, 256>}, {transform_indices = @transform_2, window_bounds = array<i64: 2, 1, 256>}, {transform_indices = @transform_3, window_bounds = array<i64: 1, 8, 128>}]} {
    %c0 = arith.constant 0 : index
    %c0_0 = arith.constant 0 : index
    %c0_1 = arith.constant 0 : index
    %0 = vector.load %arg1[%c0, %c0_0, %c0_1] : memref<2x4x256xf32, #tpu.memory_space<vmem>>, vector<2x4x256xf32>
    %c0_2 = arith.constant 0 : index
    %c0_3 = arith.constant 0 : index
    %c0_4 = arith.constant 0 : index
    %1 = vector.load %arg2[%c0_2, %c0_3, %c0_4] : memref<2x1x256xi32, #tpu.memory_space<vmem>>, vector<2x1x256xi32>
    %c0_5 = arith.constant 0 : index
    %c0_6 = arith.constant 0 : index
    %c0_7 = arith.constant 0 : index
    %2 = vector.load %arg3[%c0_5, %c0_6, %c0_7] : memref<2x1x256xf32, #tpu.memory_space<vmem>>, vector<2x1x256xf32>
    %cst = arith.constant 1.000000e+00 : f32
    %3 = vector.broadcast %cst : f32 to vector<2x1x256xf32>
    %4 = arith.cmpf oeq, %2, %3 : vector<2x1x256xf32>
    %5 = arith.extui %4 : vector<2x1x256xi1> to vector<2x1x256xi32>
    %6 = arith.sitofp %5 : vector<2x1x256xi32> to vector<2x1x256xf32>
    %cst_8 = arith.constant dense<0xFF800000> : vector<2x256xf32>
    %7 = vector.multi_reduction <maximumf>, %0, %cst_8 [1] : vector<2x4x256xf32> to vector<2x256xf32>
    %8 = vector.shape_cast %7 : vector<2x256xf32> to vector<2x1x256xf32>
    %9 = vector.broadcast %8 : vector<2x1x256xf32> to vector<2x4x256xf32>
    %10 = arith.subf %0, %9 : vector<2x4x256xf32>
    %11 = math.exp %10 : vector<2x4x256xf32>
    %cst_9 = arith.constant dense<0.000000e+00> : vector<2x256xf32>
    %12 = vector.multi_reduction <add>, %11, %cst_9 [1] : vector<2x4x256xf32> to vector<2x256xf32>
    %13 = vector.shape_cast %12 : vector<2x256xf32> to vector<2x1x256xf32>
    %14 = math.log %13 : vector<2x1x256xf32>
    %15 = vector.broadcast %14 : vector<2x1x256xf32> to vector<2x4x256xf32>
    %16 = arith.subf %10, %15 : vector<2x4x256xf32>
    %17 = tpu.iota {dimensions = array<i32: 2>} : vector<1x8x128xi32>
    %c4_i32 = arith.constant 4 : i32
    %18 = vector.broadcast %c4_i32 : i32 to vector<1x8x128xi32>
    %19 = arith.cmpi eq, %17, %18 : vector<1x8x128xi32>
    %20 = vector.shape_cast %6 : vector<2x1x256xf32> to vector<1x2x1x256xf32>
    %cst_10 = arith.constant dense<0.000000e+00> : vector<1xf32>
    %21 = vector.multi_reduction <add>, %20, %cst_10 [1, 2, 3] : vector<1x2x1x256xf32> to vector<1xf32>
    %22 = vector.shape_cast %21 : vector<1xf32> to vector<1x1x1x1xf32>
    %23 = vector.extract %22[0, 0, 0, 0] : f32 from vector<1x1x1x1xf32>
    %cst_11 = arith.constant 0.000000e+00 : f32
    %24 = vector.broadcast %23 : f32 to vector<1x8x128xf32>
    %25 = vector.broadcast %cst_11 : f32 to vector<1x8x128xf32>
    %26 = arith.select %19, %24, %25 : vector<1x8x128xi1>, vector<1x8x128xf32>
    %c0_i32 = arith.constant 0 : i32
    %27 = vector.broadcast %c0_i32 : i32 to vector<2x1x256xi32>
    %28 = arith.cmpi eq, %1, %27 : vector<2x1x256xi32>
    %29 = arith.extui %28 : vector<2x1x256xi1> to vector<2x1x256xi32>
    %30 = arith.sitofp %29 : vector<2x1x256xi32> to vector<2x1x256xf32>
    %31 = vector.extract_strided_slice %16 {offsets = [0, 0, 0], sizes = [2, 1, 256], strides = [1, 1, 1]} : vector<2x4x256xf32> to vector<2x1x256xf32>
    %cst_12 = arith.constant 0.000000e+00 : f32
    %32 = vector.broadcast %cst_12 : f32 to vector<2x1x256xf32>
    %33 = arith.subf %32, %31 : vector<2x1x256xf32>
    %34 = arith.mulf %33, %30 : vector<2x1x256xf32>
    %35 = vector.shape_cast %34 : vector<2x1x256xf32> to vector<1x2x1x256xf32>
    %cst_13 = arith.constant dense<0.000000e+00> : vector<1xf32>
    %36 = vector.multi_reduction <add>, %35, %cst_13 [1, 2, 3] : vector<1x2x1x256xf32> to vector<1xf32>
    %37 = vector.shape_cast %36 : vector<1xf32> to vector<1x1x1x1xf32>
    %38 = vector.extract %37[0, 0, 0, 0] : f32 from vector<1x1x1x1xf32>
    %c0_i32_14 = arith.constant 0 : i32
    %39 = vector.broadcast %c0_i32_14 : i32 to vector<1x8x128xi32>
    %40 = arith.cmpi eq, %17, %39 : vector<1x8x128xi32>
    %cst_15 = arith.constant 0.000000e+00 : f32
    %41 = vector.broadcast %38 : f32 to vector<1x8x128xf32>
    %42 = vector.broadcast %cst_15 : f32 to vector<1x8x128xf32>
    %43 = arith.select %40, %41, %42 : vector<1x8x128xi1>, vector<1x8x128xf32>
    %44 = arith.addf %26, %43 : vector<1x8x128xf32>
    %c1_i32 = arith.constant 1 : i32
    %45 = vector.broadcast %c1_i32 : i32 to vector<2x1x256xi32>
    %46 = arith.cmpi eq, %1, %45 : vector<2x1x256xi32>
    %47 = arith.extui %46 : vector<2x1x256xi1> to vector<2x1x256xi32>
    %48 = arith.sitofp %47 : vector<2x1x256xi32> to vector<2x1x256xf32>
    %49 = arith.mulf %48, %6 : vector<2x1x256xf32>
    %50 = vector.extract_strided_slice %16 {offsets = [0, 1, 0], sizes = [2, 1, 256], strides = [1, 1, 1]} : vector<2x4x256xf32> to vector<2x1x256xf32>
    %cst_16 = arith.constant 0.000000e+00 : f32
    %51 = vector.broadcast %cst_16 : f32 to vector<2x1x256xf32>
    %52 = arith.subf %51, %50 : vector<2x1x256xf32>
    %53 = arith.mulf %52, %49 : vector<2x1x256xf32>
    %54 = vector.shape_cast %53 : vector<2x1x256xf32> to vector<1x2x1x256xf32>
    %cst_17 = arith.constant dense<0.000000e+00> : vector<1xf32>
    %55 = vector.multi_reduction <add>, %54, %cst_17 [1, 2, 3] : vector<1x2x1x256xf32> to vector<1xf32>
    %56 = vector.shape_cast %55 : vector<1xf32> to vector<1x1x1x1xf32>
    %57 = vector.extract %56[0, 0, 0, 0] : f32 from vector<1x1x1x1xf32>
    %c1_i32_18 = arith.constant 1 : i32
    %58 = vector.broadcast %c1_i32_18 : i32 to vector<1x8x128xi32>
    %59 = arith.cmpi eq, %17, %58 : vector<1x8x128xi32>
    %cst_19 = arith.constant 0.000000e+00 : f32
    %60 = vector.broadcast %57 : f32 to vector<1x8x128xf32>
    %61 = vector.broadcast %cst_19 : f32 to vector<1x8x128xf32>
    %62 = arith.select %59, %60, %61 : vector<1x8x128xi1>, vector<1x8x128xf32>
    %63 = arith.addf %44, %62 : vector<1x8x128xf32>
    %c2_i32 = arith.constant 2 : i32
    %64 = vector.broadcast %c2_i32 : i32 to vector<2x1x256xi32>
    %65 = arith.cmpi eq, %1, %64 : vector<2x1x256xi32>
    %66 = arith.extui %65 : vector<2x1x256xi1> to vector<2x1x256xi32>
    %67 = arith.sitofp %66 : vector<2x1x256xi32> to vector<2x1x256xf32>
    %68 = arith.mulf %67, %6 : vector<2x1x256xf32>
    %69 = vector.extract_strided_slice %16 {offsets = [0, 2, 0], sizes = [2, 1, 256], strides = [1, 1, 1]} : vector<2x4x256xf32> to vector<2x1x256xf32>
    %cst_20 = arith.constant 0.000000e+00 : f32
    %70 = vector.broadcast %cst_20 : f32 to vector<2x1x256xf32>
    %71 = arith.subf %70, %69 : vector<2x1x256xf32>
    %72 = arith.mulf %71, %68 : vector<2x1x256xf32>
    %73 = vector.shape_cast %72 : vector<2x1x256xf32> to vector<1x2x1x256xf32>
    %cst_21 = arith.constant dense<0.000000e+00> : vector<1xf32>
    %74 = vector.multi_reduction <add>, %73, %cst_21 [1, 2, 3] : vector<1x2x1x256xf32> to vector<1xf32>
    %75 = vector.shape_cast %74 : vector<1xf32> to vector<1x1x1x1xf32>
    %76 = vector.extract %75[0, 0, 0, 0] : f32 from vector<1x1x1x1xf32>
    %c2_i32_22 = arith.constant 2 : i32
    %77 = vector.broadcast %c2_i32_22 : i32 to vector<1x8x128xi32>
    %78 = arith.cmpi eq, %17, %77 : vector<1x8x128xi32>
    %cst_23 = arith.constant 0.000000e+00 : f32
    %79 = vector.broadcast %76 : f32 to vector<1x8x128xf32>
    %80 = vector.broadcast %cst_23 : f32 to vector<1x8x128xf32>
    %81 = arith.select %78, %79, %80 : vector<1x8x128xi1>, vector<1x8x128xf32>
    %82 = arith.addf %63, %81 : vector<1x8x128xf32>
    %c3_i32 = arith.constant 3 : i32
    %83 = vector.broadcast %c3_i32 : i32 to vector<2x1x256xi32>
    %84 = arith.cmpi eq, %1, %83 : vector<2x1x256xi32>
    %85 = arith.extui %84 : vector<2x1x256xi1> to vector<2x1x256xi32>
    %86 = arith.sitofp %85 : vector<2x1x256xi32> to vector<2x1x256xf32>
    %87 = arith.mulf %86, %6 : vector<2x1x256xf32>
    %88 = vector.extract_strided_slice %16 {offsets = [0, 3, 0], sizes = [2, 1, 256], strides = [1, 1, 1]} : vector<2x4x256xf32> to vector<2x1x256xf32>
    %cst_24 = arith.constant 0.000000e+00 : f32
    %89 = vector.broadcast %cst_24 : f32 to vector<2x1x256xf32>
    %90 = arith.subf %89, %88 : vector<2x1x256xf32>
    %91 = arith.mulf %90, %87 : vector<2x1x256xf32>
    %92 = vector.shape_cast %91 : vector<2x1x256xf32> to vector<1x2x1x256xf32>
    %cst_25 = arith.constant dense<0.000000e+00> : vector<1xf32>
    %93 = vector.multi_reduction <add>, %92, %cst_25 [1, 2, 3] : vector<1x2x1x256xf32> to vector<1xf32>
    %94 = vector.shape_cast %93 : vector<1xf32> to vector<1x1x1x1xf32>
    %95 = vector.extract %94[0, 0, 0, 0] : f32 from vector<1x1x1x1xf32>
    %c3_i32_26 = arith.constant 3 : i32
    %96 = vector.broadcast %c3_i32_26 : i32 to vector<1x8x128xi32>
    %97 = arith.cmpi eq, %17, %96 : vector<1x8x128xi32>
    %cst_27 = arith.constant 0.000000e+00 : f32
    %98 = vector.broadcast %95 : f32 to vector<1x8x128xf32>
    %99 = vector.broadcast %cst_27 : f32 to vector<1x8x128xf32>
    %100 = arith.select %97, %98, %99 : vector<1x8x128xi1>, vector<1x8x128xf32>
    %101 = arith.addf %82, %100 : vector<1x8x128xf32>
    %c0_28 = arith.constant 0 : index
    %c0_29 = arith.constant 0 : index
    %c0_30 = arith.constant 0 : index
    %102 = vector.load %arg4[%c0_28, %c0_29, %c0_30] : memref<1x8x128xf32, #tpu.memory_space<vmem>>, vector<1x8x128xf32>
    tpu.vector_store %arg4[%c0_28, %c0_29, %c0_30], %101 {strides = array<i32>} : memref<1x8x128xf32, #tpu.memory_space<vmem>>, vector<1x8x128xf32>,
    return
  }
  func.func @transform_0(%arg0: i32) -> (i32, i32, i32) {
    %c0_i32 = arith.constant 0 : i32
    %c0_i32_0 = arith.constant 0 : i32
    %c0_i32_1 = arith.constant 0 : i32
    return %c0_i32, %c0_i32_0, %arg0 : i32, i32, i32
  }
  func.func @transform_1(%arg0: i32) -> (i32, i32, i32) {
    %c0_i32 = arith.constant 0 : i32
    %c0_i32_0 = arith.constant 0 : i32
    %c0_i32_1 = arith.constant 0 : i32
    return %c0_i32, %c0_i32_0, %arg0 : i32, i32, i32
  }
  func.func @transform_2(%arg0: i32) -> (i32, i32, i32) {
    %c0_i32 = arith.constant 0 : i32
    %c0_i32_0 = arith.constant 0 : i32
    %c0_i32_1 = arith.constant 0 : i32
    return %c0_i32, %c0_i32_0, %arg0 : i32, i32, i32
  }
  func.func @transform_3(%arg0: i32) -> (i32, i32, i32) {
    %c0_i32 = arith.constant 0 : i32
    %c0_i32_0 = arith.constant 0 : i32
    %c0_i32_1 = arith.constant 0 : i32
    return %arg0, %c0_i32, %c0_i32_0 : i32, i32, i32
  }
}

</mosaic_0001>

<bundles_post_ra>
// kernel: tpu_custom_call.1
= control target key start
LH: loop header
LB: loop body
LE: loop exit
PB: predicated region body
PF: predicated region fallthrough
CT: control target
= control target key end

     0   :  { %8 = vsyncpa [#allocation3], 0  ;;  %s830_s0 = inlined_call_operand.hbm [shape: f32[2,4,256], index: 0, kind: input, shape index: {}]   ;;  %s831_s1 = inlined_call_operand.hbm [shape: s32[2,1,256], index: 1, kind: input, shape index: {}]   ;;  %s832_s2 = inlined_call_operand.vmem [shape: f32[2,1,256], index: 2, kind: input, shape index: {}]   ;;  %s833_s3 = inlined_call_operand.hbm [shape: f32[1,8,128], index: 3, kind: output, shape index: {}]  }
   0x1   :  { %9 = vsyncpa [#allocation6], 0 }
   0x2   :  { %10 = vsyncpa [#allocation4], 0  ;;  %s612_s12 = smov [#allocation2]   ;;  %s540_s16 = scalar_lea.hbm %s830_s0, 256 }
   0x3   :  { %s16_s13 = sshll.u32 %s612_s12, 4  ;;  %p541_p0 = scmp.ne.s32.totalorder %s830_s0, %s540_s16  ;;  %s17_s13 = int_to_ptr.vmem [resolvable:$true] %s16_s13 }
   0x4   :  { %p544_p1 = scmp.lt.u32.totalorder %s540_s16, %s830_s0 }
   0x6   :  { %p546_p2 = pnand %p544_p1, %p541_p0 }
   0x8   :  { %549 = shalt.err (!%p546_p2)
}
   0x9   :  { %s550_s21 = scalar_lea.vmem %s17_s13, 256  ;;  %p555_p4 = scmp.lt.s32.totalorder %s17_s13, %s17_s13 }
   0xa   :  { %p551_p3 = scmp.ne.s32.totalorder %s17_s13, %s550_s21  ;;  %p556_p5 = scmp.lt.s32.totalorder %s550_s21, %s550_s21 }
   0xc   :  { %p557_p6 = por %p556_p5, %p555_p4 }
   0xe   :  { %p558_p7 = pnand %p557_p6, %p551_p3 }
  0x10   :  { %561 = shalt.err (!%p558_p7)
}
  0x11   :  { %s613_s22 = smov 128   ;;  %s614_s23 = smov 8  }
  0x12   :  { %22 = dma.hbm_to_vmem [thread:$0]  %s830_s0, 256, %s17_s13, [#allocation3], %s613_s22, %s613_s22, %s614_s23  }
  0x13   :  { %s615_s26 = smov [#allocation5]   ;;  %s562_s30 = scalar_lea.hbm %s831_s1, 64 }
  0x14   :  { %s28_s27 = sshll.u32 %s615_s26, 4  ;;  %p563_p8 = scmp.ne.s32.totalorder %s831_s1, %s562_s30  ;;  %s29_s27 = int_to_ptr.vmem [resolvable:$true] %s28_s27 }
  0x15   :  { %p566_p9 = scmp.lt.u32.totalorder %s562_s30, %s831_s1 }
  0x17   :  { %p568_p10 = pnand %p566_p9, %p563_p8 }
  0x19   :  { %571 = shalt.err (!%p568_p10)
}
  0x1a   :  { %s572_s8 = scalar_lea.vmem %s29_s27, 64  ;;  %p577_p12 = scmp.lt.s32.totalorder %s29_s27, %s29_s27 }
  0x1b   :  { %p573_p11 = scmp.ne.s32.totalorder %s29_s27, %s572_s8  ;;  %p578_p13 = scmp.lt.s32.totalorder %s572_s8, %s572_s8 }
  0x1d   :  { %p579_p0 = por %p578_p13, %p577_p12 }
  0x1f   :  { %p580_p1 = pnand %p579_p0, %p573_p11 }
  0x21   :  { %583 = shalt.err (!%p580_p1)
}
  0x22   :  { %s616_s0 = smov 32   ;;  %s617_s9 = smov 2  }
  0x23   :  { %34 = dma.hbm_to_vmem [thread:$0]  %s831_s1, 64, %s29_s27, [#allocation6], %s616_s0, %s616_s0, %s617_s9  }
  0x24   :  { %606 = dma.done.wait [#allocation3], 256  }
  0x25   :  { %607 = vsyncadd [#allocation3], 4294967040 }
  0x26   :  { %608 = dma.done.wait [#allocation6], 64  }
  0x27   :  { %609 = vsyncadd [#allocation6], 4294967232  ;;  %v156_v0 = vlaneseq  ;;  %vm61_vm0 = vcmask 1043456   ;;  %v47_v4 = vld [vmem:[%s832_s2] sm:$0x3]  ;;  %vm181_vm1 = vcmask 1040384  }
  0x28   :  { %v48_v5 = vld [vmem:[%s832_s2 + $0x2] sm:$0x3]  ;;  %v618_v7 = vmov 286326784   ;;  %vm49_vm2 = vcmp.eq.f32.partialorder %v47_v4, 1.0  ;;  %v682_v9 = vld [vmem:[#allocation2 + $0x8] sm:$0xff]  ;;  %v619_v12 = vmov 0.0  }
  0x29   :  { %v666_v1 = vshrl.u32 %v156_v0, 7  ;;  %v680_v6 = vld [vmem:[#allocation2] sm:$0xff]  ;;  %v211_v8 = vunpack.c.l.s4 %v618_v7  ;;  %vm50_vm3 = vcmp.eq.f32.partialorder %v48_v5, 1.0  ;;  %v689_v13 = vsel %vm49_vm2, 1.0, %v619_v12  ;;  %v46_v21 = vld [vmem:[#allocation5 + $0x2] sm:$0x3] }
  0x2a   :  { %v57_v10 = vcombine.high %v680_v6, %v680_v6  ;;  %v62_v11 = vsel %vm61_vm0, %v680_v6, -inf  ;;  %v692_v14 = vsel %vm50_vm3, 1.0, %v619_v12  ;;  %v58_v15 = vcombine.high %v682_v9, %v682_v9  ;;  %v711_v31 = vld [vmem:[#allocation5] sm:$0x3]  ;;  %s620_s19 = smov [#allocation7]  }
  0x2b   :  { %v669_v2 = vsub.s32 0, %v666_v1  ;;  %v672_v3 = vsub.s32 1, %v666_v1  ;;  %v63_v16 = vrot.slane %v62_v11, 4  ;;  %v76_v24 = vsel %vm61_vm0, %v682_v9, -inf  ;;  %s487_s20 = sshll.u32 %s620_s19, 4  ;;  %s488_s20 = int_to_ptr.vmem [resolvable:$true] %s487_s20 }
  0x2c   :  { %v69_v23 = vsel %vm61_vm0, %v57_v10, -inf  ;;  %v83_v25 = vsel %vm61_vm0, %v58_v15, -inf  ;;  %v212_v29 = vunpack.c.0.s8 %v211_v8  ;;  %v77_v34 = vrot.slane %v76_v24, 4  ;;  %s584_s21 = scalar_lea.vmem %s488_s20, 128  ;;  %p589_p3 = scmp.lt.s32.totalorder %s488_s20, %s488_s20 }
  0x2d   :  { %v164_v17 = vrot.slane %v689_v13, %v669_v2  ;;  %v168_v18 = vrot.slane %v689_v13, %v672_v3  ;;  %v172_v19 = vrot.slane %v692_v14, %v669_v2  ;;  %v176_v20 = vrot.slane %v692_v14, %v672_v3  ;;  %p585_p2 = scmp.ne.s32.totalorder %s488_s20, %s584_s21  ;;  %p590_p4 = scmp.lt.s32.totalorder %s584_s21, %s584_s21 }
  0x2e   :  { %v64_v22 = vmax.f32 %v62_v11, %v63_v16  ;;  %v70_v33 = vrot.slane %v69_v23, 4  ;;  %v84_v36 = vrot.slane %v83_v25, 4  ;;  %vm271_vm4 = vcmp.eq.s32.totalorder %v46_v21, 1 }
  0x2f   :  { %v182_v26 = vsel %vm181_vm1, %v164_v17, 0.0  ;;  %v183_v27 = vsel %vm181_vm1, %v168_v18, 0.0  ;;  %v185_v28 = vsel %vm181_vm1, %v172_v19, 0.0  ;;  %v187_v35 = vsel %vm181_vm1, %v176_v20, 0.0  ;;  %p591_p5 = por %p590_p4, %p589_p3 }
  0x30   :  { %v184_v30 = vadd.f32 %v183_v27, %v182_v26  ;;  %v65_v32 = vrot.slane %v64_v22, 2  ;;  %vm200_vm5 = vcmp.eq.s32.totalorder %v711_v31, 0  ;;  %v71_v39 = vmax.f32 %v69_v23, %v70_v33 }
  0x31   :  { %v78_v40 = vmax.f32 %v76_v24, %v77_v34  ;;  %v85_v41 = vmax.f32 %v83_v25, %v84_v36  ;;  %v716_v42 = vsub.s32 %v212_v29, %v666_v1  ;;  %v502_v43 = vsel %vm271_vm4, 1.0, %v619_v12  ;;  %p592_p6 = pnand %p591_p5, %p585_p2 }
  0x32   :  { %v186_v37 = vadd.f32 %v185_v28, %v184_v30  ;;  %v66_v38 = vmax.f32 %v64_v22, %v65_v32  ;;  %vm201_vm6 = vcmp.eq.s32.totalorder %v46_v21, 0  ;;  %v72_v46 = vrot.slane %v71_v39, 2 }
  0x33   :  { %v79_v47 = vrot.slane %v78_v40, 2  ;;  %v86_v48 = vrot.slane %v85_v41, 2  ;;  %v720_v49 = vmul.f32 %v502_v43, %v692_v14  ;;  %v723_v50 = vsel %vm200_vm5, 1.0, %v619_v12 }
  0x34   :  { %v188_v44 = vadd.f32 %v187_v35, %v186_v37  ;;  %v67_v45 = vrot.slane %v66_v38, 1  ;;  %v73_v51 = vmax.f32 %v71_v39, %v72_v46  ;;  %v726_v53 = vsel %vm201_vm6, 1.0, %v619_v12 }
  0x35   :  { %v80_v52 = vmax.f32 %v78_v40, %v79_v47  ;;  %v87_v55 = vmax.f32 %v85_v41, %v86_v48  ;;  %v293_v56 = vrot.slane %v720_v49, %v716_v42  ;;  %v216_v57 = vrot.slane %v723_v50, %v716_v42 }
  0x36   :  { %189 = vadd.xlane.f32.xlu0 %v188_v44  ;;  %v68_v54 = vmax.f32 %v66_v38, %v67_v45  ;;  %v74_v58 = vrot.slane %v73_v51, 1  ;;  %v223_v60 = vrot.slane %v726_v53, %v716_v42  ;;  %vm340_vm7 = vcmp.eq.s32.totalorder %v711_v31, 2 }
  0x37   :  { %v81_v59 = vrot.slane %v80_v52, 1  ;;  %v88_v61 = vrot.slane %v87_v55, 1  ;;  %vm341_vm8 = vcmp.eq.s32.totalorder %v46_v21, 2  ;;  %v503_v62 = vsel %vm340_vm7, 1.0, %v619_v12 }
  0x38   :  { %vm410_vm9 = vcmp.eq.s32.totalorder %v711_v31, 3  ;;  %v75_v63 = vmax.f32 %v73_v51, %v74_v58  ;;  %v504_v5 = vsel %vm341_vm8, 1.0, %v619_v12  ;;  %v739_v7 = vmul.f32 %v503_v62, %v689_v13 }
  0x39   :  { %v82_v4 = vmax.f32 %v80_v52, %v81_v59  ;;  %v89_v8 = vmax.f32 %v87_v55, %v88_v61  ;;  %v742_v10 = vmul.f32 %v504_v5, %v692_v14  ;;  %vm411_vm10 = vcmp.eq.s32.totalorder %v46_v21, 3 }
  0x3a   :  { %v505_v11 = vsel %vm410_vm9, 1.0, %v619_v12  ;;  %v94_v15 = vcombine.low %v68_v54, %v75_v63  ;;  %v356_v16 = vrot.slane %v739_v7, %v716_v42  ;;  %v506_v17 = vsel %vm411_vm10, 1.0, %v619_v12 }
  0x3b   :  { %v749_v18 = vmul.f32 %v505_v11, %v689_v13  ;;  %v95_v19 = vcombine.low %v82_v4, %v89_v8  ;;  %v363_v20 = vrot.slane %v742_v10, %v716_v42  ;;  %v754_v22 = vmul.f32 %v506_v17, %v692_v14 }
  0x3c   :  { %v98_v21 = vsub.f32 %v680_v6, %v94_v15  ;;  %vm270_vm11 = vcmp.eq.s32.totalorder %v711_v31, 1  ;;  %v306_v31 = vsub.s32 5, %v666_v1 }
  0x3d   :  { %v426_v23 = vrot.slane %v749_v18, %v716_v42  ;;  %v99_v24 = vsub.f32 %v682_v9, %v95_v19  ;;  %v433_v25 = vrot.slane %v754_v22, %v716_v42  ;;  %v501_v8 = vsel %vm270_vm11, 1.0, %v619_v12 }
  0x3e   :  { %v100_v26 = vmul.f32 1.442695, %v98_v21  ;;  %v236_v12 = vsub.s32 4, %v666_v1 }
  0x3f   :  { %v102_v27 = vmul.f32 1.442695, %v99_v24 }
  0x40   :  { %528 = vpow2.f32 %v100_v26 }
  0x41   :  { %530 = vpow2.f32 %v102_v27 }
  0x4a   :  { %v529_v28 = vpop.eup %528 }
  0x4b   :  { %v531_v29 = vpop.eup %530  ;;  %v106_v30 = vcombine.high %v529_v28, %v529_v28  ;;  %v110_v14 = vsel %vm61_vm0, %v529_v28, 0.0  ;;  %v276_v28 = vmul.f32 %v501_v8, %v689_v13  ;;  %v446_v13 = vsub.s32 7, %v666_v1 }
  0x4c   :  { %v107_v32 = vcombine.high %v531_v29, %v531_v29  ;;  %v111_v33 = vrot.slane %v110_v14, 4  ;;  %v124_v6 = vsel %vm61_vm0, %v531_v29, 0.0 }
  0x4d   :  { %v117_v34 = vsel %vm61_vm0, %v106_v30, 0.0  ;;  %v125_v35 = vrot.slane %v124_v6, 4 }
  0x4e   :  { %v112_v9 = vadd.f32 %v111_v33, %v110_v14  ;;  %v118_v36 = vrot.slane %v117_v34, 4  ;;  %v131_v37 = vsel %vm61_vm0, %v107_v32, 0.0  ;;  %v286_v33 = vrot.slane %v276_v28, %v716_v42 }
  0x4f   :  { %v126_v38 = vadd.f32 %v125_v35, %v124_v6  ;;  %v132_v39 = vrot.slane %v131_v37, 4  ;;  %v372_v35 = vsub.s32 2, %v666_v1 }
  0x50   :  { %v113_v40 = vrot.slane %v112_v9, 2  ;;  %v119_v41 = vadd.f32 %v118_v36, %v117_v34  ;;  %v376_v36 = vsub.s32 6, %v666_v1 }
  0x51   :  { %v127_v43 = vrot.slane %v126_v38, 2  ;;  %v133_v44 = vadd.f32 %v132_v39, %v131_v37  ;;  %v442_v37 = vsub.s32 3, %v666_v1 }
  0x52   :  { %v114_v45 = vadd.f32 %v113_v40, %v112_v9  ;;  %v120_v46 = vrot.slane %v119_v41, 2 }
  0x53   :  { %v128_v47 = vadd.f32 %v127_v43, %v126_v38  ;;  %v134_v48 = vrot.slane %v133_v44, 2 }
  0x54   :  { %v115_v51 = vrot.slane %v114_v45, 1  ;;  %v121_v52 = vadd.f32 %v120_v46, %v119_v41 }
  0x55   :  { %v129_v54 = vrot.slane %v128_v47, 1  ;;  %v135_v55 = vadd.f32 %v134_v48, %v133_v44 }
  0x56   :  { %v116_v58 = vadd.f32 %v115_v51, %v114_v45  ;;  %v122_v59 = vrot.slane %v121_v52, 1 }
  0x57   :  { %v130_v61 = vadd.f32 %v129_v54, %v128_v47  ;;  %v136_v62 = vrot.slane %v135_v55, 1 }
  0x58   :  { %v123_v63 = vadd.f32 %v122_v59, %v121_v52  ;;  %532 = vlog2.f32 %v116_v58 }
  0x59   :  { %v137_v4 = vadd.f32 %v136_v62, %v135_v55  ;;  %534 = vlog2.f32 %v130_v61 }
  0x5a   :  { %536 = vlog2.f32 %v123_v63 }
  0x5b   :  { %538 = vlog2.f32 %v137_v4 }
  0x62   :  { %v533_v5 = vpop.eup %532 }
  0x63   :  { %v535_v11 = vpop.eup %534  ;;  %v139_v15 = vmul.f32 0.6931472, %v533_v5 }
  0x64   :  { %v537_v17 = vpop.eup %536  ;;  %v143_v19 = vmul.f32 0.6931472, %v535_v11 }
  0x65   :  { %v539_v26 = vpop.eup %538  ;;  %v141_v27 = vmul.f32 0.6931472, %v537_v17 }
  0x66   :  { %v145_v29 = vmul.f32 0.6931472, %v539_v26 }
  0x67   :  { %v150_v30 = vcombine.low %v139_v15, %v141_v27 }
  0x68   :  { %v151_v14 = vcombine.low %v143_v19, %v145_v29 }
  0x69   :  { %v154_v32 = vsub.f32 %v98_v21, %v150_v30 }
  0x6a   :  { %v155_v6 = vsub.f32 %v99_v24, %v151_v14 }
  0x6b   :  { %v206_v34 = vsub.f32 0.0, %v154_v32 }
  0x6c   :  { %v207_v9 = vsub.f32 0.0, %v155_v6 }
  0x6d   :  { %v296_v38 = vmul.f32 %v286_v33, %v206_v34  ;;  %v226_v21 = vmul.f32 %v216_v57, %v206_v34  ;;  %v366_v24 = vmul.f32 %v356_v16, %v206_v34  ;;  %v436_v39 = vmul.f32 %v426_v23, %v206_v34 }
  0x6e   :  { %v297_v40 = vmul.f32 %v293_v56, %v207_v9  ;;  %v227_v1 = vmul.f32 %v223_v60, %v207_v9  ;;  %v367_v50 = vmul.f32 %v363_v20, %v207_v9  ;;  %v437_v57 = vmul.f32 %v433_v25, %v207_v9 }
  0x6f   :  { %v303_v7 = vrot.slane %v296_v38, %v672_v3  ;;  %v307_v16 = vrot.slane %v296_v38, %v306_v31  ;;  %v233_v18 = vrot.slane %v226_v21, %v669_v2  ;;  %v237_v23 = vrot.slane %v226_v21, %v236_v12 }
  0x70   :  { %v311_v49 = vrot.slane %v297_v40, %v672_v3  ;;  %v315_v56 = vrot.slane %v297_v40, %v306_v31  ;;  %v241_v53 = vrot.slane %v227_v1, %v669_v2  ;;  %v245_v60 = vrot.slane %v227_v1, %v236_v12 }
  0x71   :  { %v320_v41 = vsel %vm181_vm1, %v303_v7, 0.0  ;;  %v321_v10 = vsel %vm181_vm1, %v307_v16, 0.0  ;;  %v250_v20 = vsel %vm181_vm1, %v233_v18, 0.0  ;;  %v251_v42 = vsel %vm181_vm1, %v237_v23, 0.0 }
  0x72   :  { %v322_v22 = vadd.f32 %v321_v10, %v320_v41  ;;  %v323_v25 = vsel %vm181_vm1, %v311_v49, 0.0  ;;  %v325_v43 = vsel %vm181_vm1, %v315_v56, 0.0  ;;  %v252_v44 = vadd.f32 %v251_v42, %v250_v20 }
  0x73   :  { %v253_v3 = vsel %vm181_vm1, %v241_v53, 0.0  ;;  %v255_v45 = vsel %vm181_vm1, %v245_v60, 0.0  ;;  %v373_v2 = vrot.slane %v366_v24, %v372_v35  ;;  %v377_v46 = vrot.slane %v366_v24, %v376_v36 }
  0x74   :  { %v324_v47 = vadd.f32 %v323_v25, %v322_v22  ;;  %v254_v48 = vadd.f32 %v253_v3, %v252_v44  ;;  %v381_v51 = vrot.slane %v367_v50, %v372_v35  ;;  %v385_v52 = vrot.slane %v367_v50, %v376_v36 }
  0x75   :  { %v390_v54 = vsel %vm181_vm1, %v373_v2, 0.0  ;;  %v391_v55 = vsel %vm181_vm1, %v377_v46, 0.0  ;;  %v443_v58 = vrot.slane %v436_v39, %v442_v37  ;;  %v447_v59 = vrot.slane %v436_v39, %v446_v13 }
  0x76   :  { %v326_v61 = vadd.f32 %v325_v43, %v324_v47  ;;  %v256_v62 = vadd.f32 %v255_v45, %v254_v48  ;;  %v392_v63 = vadd.f32 %v391_v55, %v390_v54  ;;  %v393_v4 = vsel %vm181_vm1, %v381_v51, 0.0 }
  0x77   :  { %v395_v5 = vsel %vm181_vm1, %v385_v52, 0.0  ;;  %v451_v8 = vrot.slane %v437_v57, %v442_v37  ;;  %v455_v11 = vrot.slane %v437_v57, %v446_v13  ;;  %v460_v15 = vsel %vm181_vm1, %v443_v58, 0.0 }
  0x78   :  { %327 = vadd.xlane.f32.xlu1 %v326_v61  ;;  %257 = vadd.xlane.f32.xlu0 %v256_v62  ;;  %v394_v17 = vadd.f32 %v393_v4, %v392_v63  ;;  %v461_v19 = vsel %vm181_vm1, %v447_v59, 0.0  ;;  %v157_v3 = vand.u32 127, %v156_v0 }
  0x79   :  { %v462_v26 = vadd.f32 %v461_v19, %v460_v15  ;;  %v463_v27 = vsel %vm181_vm1, %v451_v8, 0.0  ;;  %v465_v29 = vsel %vm181_vm1, %v455_v11, 0.0 }
  0x7a   :  { %v396_v28 = vadd.f32 %v395_v5, %v394_v17  ;;  %vm158_vm12 = vcmp.eq.s32.totalorder %v157_v3, 4  ;;  %vm266_vm13 = vcmp.eq.s32.totalorder %v157_v3, 0  ;;  %vm336_vm14 = vcmp.eq.s32.totalorder %v157_v3, 1 }
  0x7b   :  { %v464_v30 = vadd.f32 %v463_v27, %v462_v26  ;;  %vm406_vm15 = vcmp.eq.s32.totalorder %v157_v3, 2  ;;  %vm476_vm0 = vcmp.eq.s32.totalorder %v157_v3, 3 }
  0x7c   :  { %397 = vadd.xlane.f32.xlu1 %v396_v28 }
  0x7d   :  { %v466_v14 = vadd.f32 %v465_v29, %v464_v30 }
  0x7f   :  { %467 = vadd.xlane.f32.xlu0 %v466_v14 }
  0xc3   :  { %v190_v32 = vpop.xlane.xlu0 %189 }
  0xc4   :  { %v191_v33 = vrot.slane %v190_v32, 4 }
  0xc6   :  { %v192_v6 = vadd.f32 %v191_v33, %v190_v32 }
  0xc8   :  { %v193_v34 = vrot.slane %v192_v6, 2 }
  0xca   :  { %v194_v31 = vadd.f32 %v193_v34, %v192_v6 }
  0xcc   :  { %v195_v12 = vrot.slane %v194_v31, 1 }
  0xce   :  { %v196_v35 = vadd.f32 %v195_v12, %v194_v31 }
  0xd0   :  { %507 = vpush %v196_v35 }
 0x101   :  { %s508_s2 = spop %507 }
 0x102   :  { %v198_v45 = vstv %s508_s2 }
 0x103   :  { %v199_v46 = vsel %vm158_vm12, %v198_v45, 0.0 }
 0x105   :  { %v328_v9 = vpop.xlane.xlu1 %327  ;;  %v258_v36 = vpop.xlane.xlu0 %257 }
 0x106   :  { %v329_v37 = vrot.slane %v328_v9, 4  ;;  %v259_v13 = vrot.slane %v258_v36, 4 }
 0x108   :  { %v330_v38 = vadd.f32 %v329_v37, %v328_v9  ;;  %v260_v21 = vadd.f32 %v259_v13, %v258_v36 }
 0x109   :  { %v398_v24 = vpop.xlane.xlu1 %397 }
 0x10a   :  { %v331_v39 = vrot.slane %v330_v38, 2  ;;  %v261_v40 = vrot.slane %v260_v21, 2  ;;  %v399_v1 = vrot.slane %v398_v24, 4 }
 0x10c   :  { %v400_v50 = vadd.f32 %v399_v1, %v398_v24  ;;  %v468_v57 = vpop.xlane.xlu0 %467  ;;  %v262_v7 = vadd.f32 %v261_v40, %v260_v21  ;;  %v332_v16 = vadd.f32 %v331_v39, %v330_v38 }
 0x10d   :  { %v469_v18 = vrot.slane %v468_v57, 4 }
 0x10e   :  { %v401_v23 = vrot.slane %v400_v50, 2  ;;  %v263_v49 = vrot.slane %v262_v7, 1  ;;  %v333_v56 = vrot.slane %v332_v16, 1 }
 0x10f   :  { %v470_v53 = vadd.f32 %v469_v18, %v468_v57 }
 0x110   :  { %v402_v60 = vadd.f32 %v401_v23, %v400_v50  ;;  %v264_v41 = vadd.f32 %v263_v49, %v262_v7  ;;  %v334_v10 = vadd.f32 %v333_v56, %v332_v16 }
 0x111   :  { %v471_v20 = vrot.slane %v470_v53, 2 }
 0x112   :  { %509 = vpush %v264_v41  ;;  %v403_v42 = vrot.slane %v402_v60, 1 }
 0x113   :  { %v472_v22 = vadd.f32 %v471_v20, %v470_v53  ;;  %511 = vpush %v334_v10 }
 0x114   :  { %v404_v25 = vadd.f32 %v403_v42, %v402_v60 }
 0x115   :  { %v473_v43 = vrot.slane %v472_v22, 1 }
 0x116   :  { %513 = vpush %v404_v25 }
 0x117   :  { %v474_v44 = vadd.f32 %v473_v43, %v472_v22 }
 0x119   :  { %515 = vpush %v474_v44 }
 0x143   :  { %s510_s15 = spop %509 }
 0x144   :  { %v267_v2 = vstv %s510_s15  ;;  %s512_s16 = spop %511 }
 0x145   :  { %v268_v47 = vsel %vm266_vm13, %v267_v2, 0.0  ;;  %v337_v48 = vstv %s512_s16 }
 0x146   :  { %v269_v51 = vadd.f32 %v268_v47, %v199_v46  ;;  %v338_v52 = vsel %vm336_vm14, %v337_v48, 0.0 }
 0x147   :  { %s514_s17 = spop %513 }
 0x148   :  { %v339_v54 = vadd.f32 %v338_v52, %v269_v51  ;;  %v407_v55 = vstv %s514_s17 }
 0x149   :  { %v408_v58 = vsel %vm406_vm15, %v407_v55, 0.0 }
 0x14a   :  { %v409_v0 = vadd.f32 %v408_v58, %v339_v54  ;;  %s516_s18 = spop %515 }
 0x14b   :  { %v477_v59 = vstv %s516_s18 }
 0x14c   :  { %v478_v61 = vsel %vm476_vm0, %v477_v59, 0.0 }
 0x14d   :  { %v479_v62 = vadd.f32 %v478_v61, %v409_v0 }
 0x14f   :  { %480 = vst [vmem:[#allocation7] sm:$0xff] %v479_v62 }
 0x150   :  { %595 = shalt.err (!%p592_p6)
}
 0x151   :  { %s596_s24 = scalar_lea.hbm %s833_s3, 128 }
 0x152   :  { %p597_p7 = scmp.ne.s32.totalorder %s833_s3, %s596_s24  ;;  %p600_p8 = scmp.lt.u32.totalorder %s596_s24, %s833_s3 }
 0x154   :  { %p602_p9 = pnand %p600_p8, %p597_p7 }
 0x156   :  { %605 = shalt.err (!%p602_p9)
}
 0x157   :  { %490 = dma.vmem_to_hbm [thread:$0]  %s488_s20, 128, %s833_s3, [#allocation4]  }
 0x158   :  { %610 = dma.done.wait [#allocation4], 128  }
 0x159   :  { %611 = vsyncadd [#allocation4], 4294967168 }
 0x15a   :  { %494 = vsyncpa [#allocation3], 1 }
 0x15b   :  { %495 = vsyncpa [#allocation6], 1 }
 0x15c   :  { %496 = vsyncpa [#allocation4], 1 }

</bundles_post_ra>
